<compile_context>
chip_gen: v6e
topology: v6e:2x2x1
jax: 0.10.0
libtpu: 0.0.40
codegen_flags: <defaults>
</compile_context>

<pallas_src>
import jax
import jax.numpy as jnp
from jax import lax
from jax.experimental import pallas as pl
from jax.experimental.pallas import tpu as pltpu


def _row_align(dtype):
    # sublane-tile multiple required for a batch tile of this dtype
    return {4: 8, 2: 16, 1: 32}.get(jnp.dtype(dtype).itemsize, 8)


def _vmem_capacity_bytes():
    """Best-effort physical VMEM capacity; falls back to the v7x-safe 64 MiB."""
    try:
        info = pltpu.get_tpu_info()
        for attr in ("vmem_capacity_bytes", "vmem_size_bytes", "vmem_bytes"):
            cap = getattr(info, attr, None)
            if cap:
                return int(cap)
    except Exception:
        pass
    try:
        kind = jax.devices()[0].device_kind.lower()
        if "v7" not in kind and any(s in kind for s in ("v4", "v5", "v6", "trillium")):
            return 128 * 1024 * 1024
    except Exception:
        pass
    return 64 * 1024 * 1024


def _make_stream_kernel(b_true, tb, slab, tiles_per_part, needs_mask):
    """Streams a (TB, L) tile of |x - y| into an (8, L) partial column sum."""
    n_slabs = tb // slab
    folds = slab // 8

    def kernel(x_ref, y_ref, acc_ref):
        c = pl.program_id(0)
        t = pl.program_id(1)

        @pl.when(t == 0)
        def _init():
            acc_ref[...] = jnp.zeros_like(acc_ref)

        l_cols = x_ref.shape[1]
        # Global row index of this tile's first row (uses the *unclamped* tile
        # index, so phantom tiles from the C-way split mask to all-zero).
        tile_row0 = (c * tiles_per_part + t) * tb

        def slab_body(i, acc):
            off = pl.multiple_of(i * slab, slab)
            xs = x_ref[pl.ds(off, slab), :].astype(jnp.float32)
            ys = y_ref[pl.ds(off, slab), :].astype(jnp.float32)
            d = jnp.abs(xs - ys)                                   # [slab, L]
            if needs_mask:
                rid = (tile_row0 + off
                       + lax.broadcasted_iota(jnp.int32, (slab, 1), 0))
                d = jnp.where(rid < b_true, d, 0.0)
            # Fold the slab down to 8 sublanes with tile-aligned static slices
            # (pure VALU adds; no XLU, no reshape).
            part = d[0:8, :]
            for f in range(1, folds):
                part = part + d[8 * f:8 * (f + 1), :]
            return acc + part

        acc_ref[...] += lax.fori_loop(
            0, n_slabs, slab_body, jnp.zeros((8, l_cols), jnp.float32))

    return kernel


def _make_finalize_kernel(b_true, l_true, n_parts):
    """Combines partial column sums, does argmins / range MAEs, writes scalar."""
    b_f = float(b_true)
    l_f = float(l_true)

    def kernel(colsum_ref, ppm_ref, out_ref):
        cs3 = colsum_ref[...]                          # [C, 8, L] f32
        cs8 = cs3[0]
        for i in range(1, n_parts):
            cs8 = cs8 + cs3[i]                         # [8, L]
        col = jnp.sum(cs8, axis=0, keepdims=True)      # [1, L] (one-time reduce)

        ppm = ppm_ref[...].astype(jnp.float32)         # [P, L]
        p_rows, l_cols = ppm.shape
        col_ids = lax.broadcasted_iota(jnp.int32, (p_rows, l_cols), 1)
        # hoisted broadcast (JAX does not CSE broadcast_in_dim)
        cs_b = jnp.broadcast_to(col, (p_rows, l_cols))

        def argmin_first(target):
            # torch.argmin over dim=1 with first-occurrence tie-breaking.
            d = jnp.abs(ppm - jnp.float32(target))
            dmin = jnp.min(d, axis=1, keepdims=True)
            return jnp.min(jnp.where(d == dmin, col_ids, l_cols),
                           axis=1, keepdims=True)      # [P, 1] int32

        def range_mae(lo_idx, hi_idx):
            # per ppm row i: mean(|x - y|[:, lo_i:hi_i]); averaged over P rows.
            # NaN if the slice is empty (matches torch mean of an empty slice).
            mask = (col_ids >= lo_idx) & (col_ids < hi_idx)          # [P, L]
            num = jnp.sum(jnp.where(mask, cs_b, 0.0), axis=1)        # [P]
            cnt = jnp.sum(mask.astype(jnp.float32), axis=1)          # [P]
            per_row = num / (cnt * jnp.float32(b_f))
            return jnp.sum(per_row) / jnp.float32(p_rows)

        gaba_mae = range_mae(argmin_first(3.2), argmin_first(2.8))
        glx_mae = range_mae(argmin_first(3.95), argmin_first(3.55))
        global_mae = jnp.sum(col) / jnp.float32(b_f * l_f)

        result = (gaba_mae * 8.0 + glx_mae + global_mae) / 10.0
        out_ref[...] = jnp.full((1, 1), result, dtype=out_ref.dtype)

    return kernel


def range_mae_loss_ppm_vary(x, y, ppm, *, tb_rows=None, num_partials=2):
    """Pallas TPU implementation of RangeMAELossPPMVary.forward. Returns a scalar."""
    x = jnp.asarray(x)
    y = jnp.asarray(y)
    ppm = jnp.asarray(ppm)
    if x.ndim != 2 or y.shape != x.shape or ppm.ndim != 2 or ppm.shape[1] != x.shape[1]:
        raise ValueError("expected x, y: [B, L] with matching shapes and ppm: [P, L]")
    B, L = (int(s) for s in x.shape)
    P = int(ppm.shape[0])

    isz_x = jnp.dtype(x.dtype).itemsize
    isz_y = jnp.dtype(y.dtype).itemsize
    row_align = max(_row_align(x.dtype), _row_align(y.dtype))
    slab = row_align

    # Generation-aware budgets: 128-MiB VMEM parts (v4/v5e/v5p/v6e) get larger
    # double-buffered tiles and a higher scoped limit than 64-MiB v7x.
    vmem_cap = _vmem_capacity_bytes()
    big_vmem = vmem_cap >= 100 * 1024 * 1024
    budget = (64 if big_vmem else 30) * 1024 * 1024      # streaming working set
    cap = (96 if big_vmem else 56) * 1024 * 1024         # scoped-VMEM ceiling

    per_row = 2 * L * (isz_x + isz_y)                    # dbl-buffered native x & y
    fixed = (2 * 8 * L * 4            # double-buffered (8, L) partial-sum out block
             + 6 * slab * L * 4       # f32 slab temporaries
             + 8 * L * 4              # fori-loop carry
             + (2 << 20))             # headroom
    B_align = ((B + row_align - 1) // row_align) * row_align

    if tb_rows is None:
        tb = max(budget - fixed, per_row * row_align) // per_row
    else:
        tb = int(tb_rows)
    tb = max(row_align, (tb // row_align) * row_align)
    tb = min(tb, B_align)
    TB = int(tb)

    T_total = pl.cdiv(B, TB)                 # real batch tiles
    C = max(1, min(int(num_partials), T_total))
    T = pl.cdiv(T_total, C)                  # tiles per partial / per core
    needs_mask = (C * T * TB) != B           # ragged last tile or phantom tiles
    last_tile = T_total - 1

    est = 2 * TB * L * (isz_x + isz_y) + fixed
    vmem_limit = int(min(max(int(est * 1.2), 32 * 1024 * 1024), cap))

    def xy_map(c, t):
        # Clamp phantom tiles of the C-way split onto the core's previous tile
        # (Pallas elides the repeat DMA); their rows are masked in-kernel.
        return (jnp.minimum(c * T + t, last_tile), 0)

    colsum = pl.pallas_call(
        _make_stream_kernel(B, TB, slab, T, needs_mask),
        out_shape=jax.ShapeDtypeStruct((C, 8, L), jnp.float32),
        grid_spec=pltpu.PrefetchScalarGridSpec(
            num_scalar_prefetch=0,
            grid=(C, T),
            in_specs=[
                pl.BlockSpec((TB, L), xy_map),
                pl.BlockSpec((TB, L), xy_map),
            ],
            out_specs=pl.BlockSpec((None, 8, L), lambda c, t: (c, 0, 0)),
        ),
        compiler_params=pltpu.CompilerParams(
            dimension_semantics=("parallel", "arbitrary"),
            vmem_limit_bytes=vmem_limit,
        ),
    )(x, y)

    fin_bytes = (C * 8 * L * 4 + P * L * jnp.dtype(ppm.dtype).itemsize
                 + 10 * P * L * 4 + (1 << 20))
    fin_vmem = int(min(max(2 * fin_bytes, 32 * 1024 * 1024), cap))

    out = pl.pallas_call(
        _make_finalize_kernel(B, L, C),
        out_shape=jax.ShapeDtypeStruct((1, 1), jnp.float32),
        grid_spec=pltpu.PrefetchScalarGridSpec(
            num_scalar_prefetch=0,
            grid=(1,),
            in_specs=[
                pl.BlockSpec((C, 8, L), lambda i: (0, 0, 0)),
                pl.BlockSpec((P, L), lambda i: (0, 0)),
            ],
            out_specs=pl.BlockSpec((1, 1), lambda i: (0, 0)),
        ),
        compiler_params=pltpu.CompilerParams(
            dimension_semantics=("arbitrary",),
            vmem_limit_bytes=fin_vmem,
        ),
    )(colsum, ppm)
    return out[0, 0]


def _reference(x, y, ppm):
    # Pure-JAX reference mirroring the PyTorch code (for correctness checking).
    x = x.astype(jnp.float32)
    y = y.astype(jnp.float32)
    ppm = ppm.astype(jnp.float32)
    B, L = x.shape
    P = ppm.shape[0]
    gaba_lo = jnp.argmin(jnp.abs(ppm - 3.2), axis=1)
    gaba_hi = jnp.argmin(jnp.abs(ppm - 2.8), axis=1)
    glx_lo = jnp.argmin(jnp.abs(ppm - 3.95), axis=1)
    glx_hi = jnp.argmin(jnp.abs(ppm - 3.55), axis=1)
    absdiff = jnp.abs(x - y)
    col_ids = jnp.arange(L)

    def rng_mae(lo, hi):
        acc = 0.0
        for i in range(P):
            m = (col_ids >= lo[i]) & (col_ids < hi[i])
            cnt = jnp.sum(m)
            acc = acc + jnp.sum(jnp.where(m[None, :], absdiff, 0.0)) / (cnt * B)
        return acc / P

    gaba_mae = rng_mae(gaba_lo, gaba_hi)
    glx_mae = rng_mae(glx_lo, glx_hi)
    global_mae = jnp.mean(jnp.mean(absdiff, axis=1), axis=0)
    return (gaba_mae * 8.0 + glx_mae + global_mae) / 10.0


if __name__ == "__main__":
    key = jax.random.PRNGKey(0)
    kx, ky, kj = jax.random.split(key, 3)

    # Check 1: aligned shapes (descending ppm axis, per-row jitter).
    B, L, P = 4, 256, 4
    x = jax.random.normal(kx, (B, L), dtype=jnp.float32)
    y = jax.random.normal(ky, (B, L), dtype=jnp.float32)
    base = jnp.linspace(5.0, 0.0, L, dtype=jnp.float32)
    ppm = base[None, :] + 0.01 * jax.random.normal(kj, (P, 1), dtype=jnp.float32)
    loss = jax.block_until_ready(range_mae_loss_ppm_vary(x, y, ppm))
    ref = jax.block_until_ready(_reference(x, y, ppm))
    assert jnp.allclose(loss, ref, rtol=1e-5, atol=1e-6), (loss, ref)

    # Check 2: unaligned B and L, bf16 inputs (ragged batch mask, non-128 lane
    # extent, dtype-aware slab/tile sizing); no padding of any input.
    kx2, ky2, kj2 = jax.random.split(jax.random.PRNGKey(1), 3)
    B2, L2, P2 = 5, 200, 3
    x2 = jax.random.normal(kx2, (B2, L2), dtype=jnp.bfloat16)
    y2 = jax.random.normal(ky2, (B2, L2), dtype=jnp.bfloat16)
    base2 = jnp.linspace(4.5, 0.5, L2, dtype=jnp.float32)
    ppm2 = base2[None, :] + 0.01 * jax.random.normal(kj2, (P2, 1), dtype=jnp.float32)
    loss2 = jax.block_until_ready(range_mae_loss_ppm_vary(x2, y2, ppm2))
    ref2 = jax.block_until_ready(_reference(x2, y2, ppm2))
    assert jnp.allclose(loss2, ref2, rtol=1e-5, atol=1e-6), (loss2, ref2)

    # Check 3: multi-step grid with two partial column sums (tb_rows=8 forces
    # T_total=3, C=2, grid=(2, 2): exercises the accumulator init/accumulate
    # phases, the dual-partial combine and the masked phantom tile).
    kx3, ky3, kj3 = jax.random.split(jax.random.PRNGKey(2), 3)
    B3, L3, P3 = 24, 256, 4
    x3 = jax.random.normal(kx3, (B3, L3), dtype=jnp.float32)
    y3 = jax.random.normal(ky3, (B3, L3), dtype=jnp.float32)
    base3 = jnp.linspace(5.0, 0.0, L3, dtype=jnp.float32)
    ppm3 = base3[None, :] + 0.01 * jax.random.normal(kj3, (P3, 1), dtype=jnp.float32)
    loss3 = jax.block_until_ready(range_mae_loss_ppm_vary(x3, y3, ppm3, tb_rows=8))
    ref3 = jax.block_until_ready(_reference(x3, y3, ppm3))
    assert jnp.allclose(loss3, ref3, rtol=1e-5, atol=1e-6), (loss3, ref3)

    print("KERNEL_OK")
</pallas_src>

<mosaic_0001>
module attributes {stable_mosaic.version = 11 : i64} {
  func.func @kernel(%arg0: i32, %arg1: i32, %arg2: memref<8x256xf32, #tpu.memory_space<vmem>>, %arg3: memref<8x256xf32, #tpu.memory_space<vmem>>, %arg4: memref<1x8x256xf32, #tpu.memory_space<vmem>>) attributes {dimension_semantics = [#tpu.dimension_semantics<parallel>, #tpu.dimension_semantics<arbitrary>], iteration_bounds = array<i64: 1, 1>, scalar_prefetch = 0 : i64, scratch_operands = 0 : i64, tpu.core_type = #tpu.core_type<tc>, window_params = [{transform_indices = @transform_0, window_bounds = array<i64: 8, 256>}, {transform_indices = @transform_1, window_bounds = array<i64: 8, 256>}, {transform_indices = @transform_2, window_bounds = array<i64: 1, 8, 256>}]} {
    %c0_i32 = arith.constant 0 : i32
    %0 = arith.cmpi eq, %arg1, %c0_i32 : i32
    %1 = arith.extui %0 : i1 to i32
    %c0_i32_0 = arith.constant 0 : i32
    %2 = arith.cmpi ne, %1, %c0_i32_0 : i32
    scf.if %2 {
      %cst_12 = arith.constant 0.000000e+00 : f32
      %32 = vector.broadcast %cst_12 : f32 to vector<8x256xf32>
      %c0_13 = arith.constant 0 : index
      %c0_14 = arith.constant 0 : index
      %c0_15 = arith.constant 0 : index
      %33 = vector.load %arg4[%c0_13, %c0_14, %c0_15] : memref<1x8x256xf32, #tpu.memory_space<vmem>>, vector<1x8x256xf32>
      %34 = vector.shape_cast %33 : vector<1x8x256xf32> to vector<8x256xf32>
      %35 = vector.shape_cast %32 : vector<8x256xf32> to vector<1x8x256xf32>
      tpu.vector_store %arg4[%c0_13, %c0_14, %c0_15], %35 {strides = array<i32>} : memref<1x8x256xf32, #tpu.memory_space<vmem>>, vector<1x8x256xf32>,
    } else {
    }
    %c1_i32 = arith.constant 1 : i32
    %3 = arith.muli %arg0, %c1_i32 : i32
    %4 = arith.addi %3, %arg1 : i32
    %c8_i32 = arith.constant 8 : i32
    %5 = arith.muli %4, %c8_i32 : i32
    %c0 = arith.constant 0 : index
    %c0_1 = arith.constant 0 : index
    %c0_2 = arith.constant 0 : index
    %6 = vector.load %arg4[%c0, %c0_1, %c0_2] : memref<1x8x256xf32, #tpu.memory_space<vmem>>, vector<1x8x256xf32>
    %7 = vector.shape_cast %6 : vector<1x8x256xf32> to vector<8x256xf32>
    %cst = arith.constant 0.000000e+00 : f32
    %8 = vector.broadcast %cst : f32 to vector<8x256xf32>
    %c0_i32_3 = arith.constant 0 : i32
    %c8_i32_4 = arith.constant 8 : i32
    %9 = arith.muli %c0_i32_3, %c8_i32_4 : i32
    %10 = tpu.assume_multiple %9, 8 : i32
    %11 = arith.index_cast %10 : i32 to index
    %c0_5 = arith.constant 0 : index
    %12 = vector.load %arg2[%11, %c0_5] : memref<8x256xf32, #tpu.memory_space<vmem>>, vector<8x256xf32>
    %13 = arith.index_cast %10 : i32 to index
    %c0_6 = arith.constant 0 : index
    %14 = vector.load %arg3[%13, %c0_6] : memref<8x256xf32, #tpu.memory_space<vmem>>, vector<8x256xf32>
    %15 = arith.subf %12, %14 : vector<8x256xf32>
    %16 = math.absf %15 : vector<8x256xf32>
    %17 = arith.addi %5, %10 : i32
    %18 = tpu.iota {dimensions = array<i32: 0>} : vector<8x1xi32>
    %19 = vector.broadcast %17 : i32 to vector<8x1xi32>
    %20 = arith.addi %19, %18 : vector<8x1xi32>
    %c4_i32 = arith.constant 4 : i32
    %21 = vector.broadcast %c4_i32 : i32 to vector<8x1xi32>
    %22 = arith.cmpi slt, %20, %21 : vector<8x1xi32>
    %cst_7 = arith.constant 0.000000e+00 : f32
    %23 = vector.shape_cast %22 : vector<8x1xi1> to vector<8x1xi1>
    %24 = vector.broadcast %23 : vector<8x1xi1> to vector<8x256xi1>
    %25 = vector.broadcast %cst_7 : f32 to vector<8x256xf32>
    %26 = arith.select %24, %16, %25 : vector<8x256xi1>, vector<8x256xf32>
    %27 = arith.addf %8, %26 : vector<8x256xf32>
    %c1_i32_8 = arith.constant 1 : i32
    %28 = arith.addf %7, %27 : vector<8x256xf32>
    %c0_9 = arith.constant 0 : index
    %c0_10 = arith.constant 0 : index
    %c0_11 = arith.constant 0 : index
    %29 = vector.load %arg4[%c0_9, %c0_10, %c0_11] : memref<1x8x256xf32, #tpu.memory_space<vmem>>, vector<1x8x256xf32>
    %30 = vector.shape_cast %29 : vector<1x8x256xf32> to vector<8x256xf32>
    %31 = vector.shape_cast %28 : vector<8x256xf32> to vector<1x8x256xf32>
    tpu.vector_store %arg4[%c0_9, %c0_10, %c0_11], %31 {strides = array<i32>} : memref<1x8x256xf32, #tpu.memory_space<vmem>>, vector<1x8x256xf32>,
    return
  }
  func.func @transform_0(%arg0: i32, %arg1: i32) -> (i32, i32) {
    %c1_i32 = arith.constant 1 : i32
    %0 = arith.muli %arg0, %c1_i32 : i32
    %1 = arith.addi %0, %arg1 : i32
    %c0_i32 = arith.constant 0 : i32
    %2 = arith.minsi %1, %c0_i32 : i32
    %c0_i32_0 = arith.constant 0 : i32
    %c0_i32_1 = arith.constant 0 : i32
    return %2, %c0_i32_0 : i32, i32
  }
  func.func @transform_1(%arg0: i32, %arg1: i32) -> (i32, i32) {
    %c1_i32 = arith.constant 1 : i32
    %0 = arith.muli %arg0, %c1_i32 : i32
    %1 = arith.addi %0, %arg1 : i32
    %c0_i32 = arith.constant 0 : i32
    %2 = arith.minsi %1, %c0_i32 : i32
    %c0_i32_0 = arith.constant 0 : i32
    %c0_i32_1 = arith.constant 0 : i32
    return %2, %c0_i32_0 : i32, i32
  }
  func.func @transform_2(%arg0: i32, %arg1: i32) -> (i32, i32, i32) {
    %c0_i32 = arith.constant 0 : i32
    %c0_i32_0 = arith.constant 0 : i32
    %c0_i32_1 = arith.constant 0 : i32
    return %arg0, %c0_i32, %c0_i32_0 : i32, i32, i32
  }
}

</mosaic_0001>

<bundles_post_ra>
// kernel: tpu_custom_call.1
= control target key start
LH: loop header
LB: loop body
LE: loop exit
PB: predicated region body
PF: predicated region fallthrough
CT: control target
= control target key end

     0   :  { %7 = vsyncpa [#allocation3], 0  ;;  %s244_s0 = inlined_call_operand.hbm [shape: f32[4,256], index: 0, kind: input, shape index: {}]   ;;  %s245_s1 = inlined_call_operand.hbm [shape: f32[4,256], index: 1, kind: input, shape index: {}]   ;;  %s246_s2 = inlined_call_operand.hbm [shape: f32[1,8,256], index: 2, kind: output, shape index: {}]  }
   0x1   :  { %8 = vsyncpa [#allocation6], 0 }
   0x2   :  { %9 = vsyncpa [#allocation4], 0 }
   0x3   :  { %21 = vsyncadd [#allocation3], 128  ;;  %s215_s9 = smov [#allocation2]  }
   0x4   :  { %s27_s10 = sshll.u32 %s215_s9, 4  ;;  %s28_s10 = int_to_ptr.vmem [resolvable:$true] %s27_s10 }
   0x5   :  { %s157_s11 = scalar_lea.vmem %s28_s10, 128  ;;  %s161_s12 = scalar_lea.vmem %s28_s10, 256 }
   0x6   :  { %p158_p0 = scmp.ne.s32.totalorder %s28_s10, %s157_s11  ;;  %p162_p1 = scmp.lt.s32.totalorder %s28_s10, %s28_s10 }
   0x7   :  { %p163_p2 = scmp.lt.s32.totalorder %s161_s12, %s157_s11 }
   0x9   :  { %p164_p3 = por %p163_p2, %p162_p1 }
   0xb   :  { %p165_p4 = pnand %p164_p3, %p158_p0 }
   0xd   :  { %168 = shalt.err (!%p165_p4)
}
   0xe   :  { %s216_s13 = smov 128   ;;  %s217_s14 = smov 8  }
   0xf   :  { %33 = dma.hbm_to_vmem [thread:$0]  %s244_s0, 128, %s28_s10, [#allocation3], %s216_s13, %s216_s13, %s217_s14  }
  0x10   :  { %45 = vsyncadd [#allocation6], 128  ;;  %s218_s17 = smov [#allocation5]  }
  0x11   :  { %s51_s18 = sshll.u32 %s218_s17, 4  ;;  %s52_s18 = int_to_ptr.vmem [resolvable:$true] %s51_s18 }
  0x12   :  { %s177_s19 = scalar_lea.vmem %s52_s18, 128  ;;  %s181_s20 = scalar_lea.vmem %s52_s18, 256 }
  0x13   :  { %p178_p5 = scmp.ne.s32.totalorder %s52_s18, %s177_s19  ;;  %p182_p6 = scmp.lt.s32.totalorder %s52_s18, %s52_s18 }
  0x14   :  { %p183_p7 = scmp.lt.s32.totalorder %s181_s20, %s177_s19 }
  0x16   :  { %p184_p8 = por %p183_p7, %p182_p6 }
  0x18   :  { %p185_p9 = pnand %p184_p8, %p178_p5 }
  0x1a   :  { %188 = shalt.err (!%p185_p9)
}
  0x1b   :  { %57 = dma.hbm_to_vmem [thread:$0]  %s245_s1, 128, %s52_s18, [#allocation6], %s216_s13, %s216_s13, %s217_s14  }
  0x1c   :  { %209 = dma.done.wait [#allocation3], 256  }
  0x1d   :  { %210 = vsyncadd [#allocation3], 4294967040 }
  0x1e   :  { %211 = dma.done.wait [#allocation6], 256  }
  0x1f   :  { %212 = vsyncadd [#allocation6], 4294967040  ;;  %v102_v0 = vlaneseq  ;;  %v91_v1 = vld [vmem:[#allocation2] sm:$0xff]  ;;  %v92_v2 = vld [vmem:[#allocation2 + $0x8] sm:$0xff]  ;;  %s219_s0 = smov [#allocation7]  }
  0x20   :  { %v95_v3 = vld [vmem:[#allocation5] sm:$0xff]  ;;  %v96_v4 = vld [vmem:[#allocation5 + $0x8] sm:$0xff]  ;;  %s129_s23 = sshll.u32 %s219_s0, 4  ;;  %s130_s23 = int_to_ptr.vmem [resolvable:$true] %s129_s23 }
  0x21   :  { %v97_v5 = vsub.f32 %v91_v1, %v95_v3  ;;  %v103_v6 = vshrl.u32 %v102_v0, 7  ;;  %v98_v7 = vsub.f32 %v92_v2, %v96_v4  ;;  %s189_s1 = scalar_lea.vmem %s130_s23, 256  ;;  %p194_p11 = scmp.lt.s32.totalorder %s130_s23, %s130_s23 }
  0x22   :  { %p190_p10 = scmp.ne.s32.totalorder %s130_s23, %s189_s1  ;;  %p195_p12 = scmp.lt.s32.totalorder %s189_s1, %s189_s1 }
  0x23   :  { %v99_v8 = vand.u32 2147483647, %v97_v5  ;;  %v100_v9 = vand.u32 2147483647, %v98_v7  ;;  %vm106_vm0 = vcmp.lt.s32.totalorder %v103_v6, 4 }
  0x24   :  { %p196_p13 = por %p195_p12, %p194_p11 }
  0x25   :  { %v111_v10 = vcombine.low %v99_v8, %v100_v9  ;;  %v112_v11 = vcombine.high %v99_v8, %v100_v9 }
  0x26   :  { %p197_p0 = pnand %p196_p13, %p190_p10 }
  0x27   :  { %v115_v12 = vsel %vm106_vm0, %v111_v10, 0.0  ;;  %v116_v13 = vsel %vm106_vm0, %v112_v11, 0.0 }
  0x28   :  { %121 = vst [vmem:[#allocation7] sm:$0xff] %v115_v12  ;;  %122 = vst [vmem:[#allocation7 + $0x8] sm:$0xff] %v116_v13 }
  0x29   :  { %200 = shalt.err (!%p197_p0)
}
  0x2a   :  { %132 = dma.vmem_to_hbm [thread:$0]  %s130_s23, 256, %s246_s2, [#allocation4]  }
  0x2b   :  { %213 = dma.done.wait [#allocation4], 256  }
  0x2c   :  { %214 = vsyncadd [#allocation4], 4294967040 }
  0x2d   :  { %136 = vsyncpa [#allocation3], 1 }
  0x2e   :  { %137 = vsyncpa [#allocation6], 1 }
  0x2f   :  { %138 = vsyncpa [#allocation4], 1 }

</bundles_post_ra>
